<compile_context>
chip_gen: v7x
topology: tpu7x:2x2x1
jax: 0.10.0
libtpu: 0.0.40
codegen_flags: <defaults>
</compile_context>

<pallas_src>
import functools

import jax
import jax.numpy as jnp
import numpy as np
from jax.experimental import pallas as pl
from jax.experimental.pallas import tpu as pltpu


def _round_up(v: int, m: int) -> int:
    return (v + m - 1) // m * m


def _pick_tile(size_rounded: int, target: int, align: int) -> int:
    """Largest tile <= target (multiple of align) that divides size_rounded, as long as it
    doesn't shrink below ~half the target; otherwise fall back to the target (pads)."""
    target = max(align, min(target, size_rounded) // align * align)
    lo = max(align, (target // 2) // align * align)
    for cand in range(target, lo - 1, -align):
        if size_rounded % cand == 0:
            return cand
    return target


def _pad2(arr, rows: int, cols: int):
    r0, c0 = arr.shape
    if rows == r0 and cols == c0:
        return arr
    return jnp.pad(arr, ((0, rows - r0), (0, cols - c0)))


def _lora_row_parallel_kernel(x_ref, wt_ref, xa_ref, bt_ref, bias_ref, o_ref, acc_ref):
    """Grid = (M tiles, N tiles, K tiles); K is the innermost reduction axis."""
    k = pl.program_id(2)
    nk = pl.num_programs(2)

    @pl.when(k == 0)
    def _init():
        acc_ref[...] = jnp.zeros_like(acc_ref)

    # Main path: x[TM,TK] @ Wt[TK,TN]; weight was pre-transposed in the wrapper, so this is a
    # plain K-contraction — the MXU is the sole consumer of the vector-extended slot.
    acc_ref[...] += jnp.dot(x_ref[...], wt_ref[...], preferred_element_type=jnp.float32)

    @pl.when(k == nk - 1)
    def _finalize():
        # LoRA path: xa = x @ A^T was precomputed in the wrapper; only the tiny rank-RP
        # contraction with B^T runs here, once per (i, j) output tile. All f32.
        lora = jnp.dot(xa_ref[...], bt_ref[...], preferred_element_type=jnp.float32)
        o_ref[...] = (acc_ref[...] + lora + bias_ref[...]).astype(o_ref.dtype)


@functools.partial(jax.jit, static_argnames=("tm", "tn", "tk"))
def row_parallel_linear_with_lora(x, weight, lora_a, lora_b, bias=None,
                                  *, tm=None, tn=None, tk=None):
    """Forward of RowParallelLinearWithLoRA (tp_size=1, LoRA fused into the matmul).

    x:      [..., K]
    weight: [N, K]   (PyTorch nn.Linear convention: out_features x in_features)
    lora_a: [r, K]
    lora_b: [N, r]
    bias:   [N] or None
    returns (output [..., N], None)
    """
    *lead, K = x.shape
    M = int(np.prod(lead)) if lead else 1
    N, Kw = weight.shape
    assert K == Kw, (K, Kw)
    r = lora_a.shape[0]
    assert lora_a.shape == (r, K), lora_a.shape
    assert lora_b.shape == (N, r), lora_b.shape

    out_dtype = x.dtype
    x_isz = jnp.dtype(x.dtype).itemsize
    w_isz = jnp.dtype(weight.dtype).itemsize
    o_isz = jnp.dtype(out_dtype).itemsize

    # Sublane packing for the activation/output dtype: 8 (f32), 16 (bf16), 32 (int8).
    sub_m = 8 * max(1, 4 // max(1, x_isz))

    # --- Tile targets ---
    tm_t = tm if tm is not None else 512
    tn_t = tn if tn is not None else 512
    tk_t = tk if tk is not None else (1024 if max(x_isz, w_isz) <= 2 else 512)

    Mr = _round_up(M, sub_m)
    Nr = _round_up(N, 128)
    Kr = _round_up(K, 128)

    if tm is None and Mr <= 1024:
        TM = Mr                                 # whole M in one tile (no padded second tile)
    else:
        TM = _pick_tile(Mr, tm_t, sub_m)
    TN = _pick_tile(Nr, tn_t, 128)
    TK = _pick_tile(Kr, tk_t, 128)
    RP = _round_up(r, 8)                        # LoRA rank padded to a sublane multiple (f32)

    Mp = _round_up(M, TM)
    Np = _round_up(N, TN)
    Kp = _round_up(K, TK)

    x2 = x.reshape(M, K)

    # LoRA-A path hoisted out of the kernel (tiny: M x r), removing the redundant per-(j,k)
    # MXU pass. Kept in f32 so the in-kernel LoRA-B dot matches the merged-weight reference.
    xa = jnp.dot(x2, lora_a.T, preferred_element_type=jnp.float32)

    # Weight pre-transposed to [K, N] -> plain contraction in the kernel.
    # TODO(synk): cache the transposed (and padded) weight at load time in production.
    wt = weight.T

    x2 = _pad2(x2, Mp, Kp)
    wt = _pad2(wt, Kp, Np)
    xa = _pad2(xa, Mp, RP)
    bt = _pad2(lora_b.astype(jnp.float32).T, RP, Np)
    if bias is None:
        bias2 = jnp.zeros((1, Np), jnp.float32)
    else:
        bias2 = _pad2(bias.astype(jnp.float32).reshape(1, N), 1, Np)

    grid = (Mp // TM, Np // TN, Kp // TK)

    # VMEM estimate with per-operand dtypes: double-buffered inputs/outputs + f32 accumulator.
    est = 2 * (TM * TK * x_isz + TK * TN * w_isz + TM * RP * 4 + RP * TN * 4 + TN * 4)
    est += 2 * TM * TN * o_isz
    est += TM * TN * 4
    try:
        vmem_cap = int(pltpu.get_tpu_info().vmem_capacity_bytes)
    except Exception:
        vmem_cap = 64 << 20  # conservative (v7x per-TC) fallback
    cap = max(vmem_cap - (16 << 20), vmem_cap // 2)
    vmem_limit = int(max(min(2 * est + (8 << 20), cap), 1 << 20))

    out2 = pl.pallas_call(
        _lora_row_parallel_kernel,
        out_shape=jax.ShapeDtypeStruct((Mp, Np), out_dtype),
        grid_spec=pltpu.PrefetchScalarGridSpec(
            num_scalar_prefetch=0,
            grid=grid,
            in_specs=[
                pl.BlockSpec((TM, TK), lambda i, j, k: (i, k)),   # x
                pl.BlockSpec((TK, TN), lambda i, j, k: (k, j)),   # W^T
                pl.BlockSpec((TM, RP), lambda i, j, k: (i, 0)),   # xa = x @ A^T (f32)
                pl.BlockSpec((RP, TN), lambda i, j, k: (0, j)),   # B^T (f32)
                pl.BlockSpec((1, TN), lambda i, j, k: (0, j)),    # bias (f32)
            ],
            out_specs=pl.BlockSpec((TM, TN), lambda i, j, k: (i, j)),
            scratch_shapes=[
                pltpu.VMEM((TM, TN), jnp.float32),   # main f32 accumulator
            ],
        ),
        compiler_params=pltpu.CompilerParams(
            dimension_semantics=("parallel", "parallel", "arbitrary"),
            vmem_limit_bytes=vmem_limit,
        ),
    )(x2, wt, xa, bt, bias2)

    output = out2[:M, :N].reshape(*lead, N)
    # skip_bias_add is False -> bias already added, output_bias is None
    return output, None


if __name__ == "__main__":
    # Small shapes consistent with the module: batch=2, seq=8, hidden(K)=32, out(N)=32, rank=4.
    B, S, K, N, R = 2, 8, 32, 32, 4

    key = jax.random.PRNGKey(0)
    kx, kw, ka, kb, kbias = jax.random.split(key, 5)

    x = jax.random.normal(kx, (B, S, K), dtype=jnp.float32)
    weight = jax.random.normal(kw, (N, K), dtype=jnp.float32) * 0.05
    lora_a = jax.random.normal(ka, (R, K), dtype=jnp.float32) * 0.05
    lora_b = jax.random.normal(kb, (N, R), dtype=jnp.float32) * 0.05
    bias = jax.random.normal(kbias, (N,), dtype=jnp.float32) * 0.01

    out, out_bias = row_parallel_linear_with_lora(x, weight, lora_a, lora_b, bias)
    out = jax.block_until_ready(out)

    # Pure-JAX reference: merged-weight form (exactly what the PyTorch module computes).
    w_merged_ref = weight + lora_b @ lora_a
    ref = x.reshape(-1, K) @ w_merged_ref.T + bias
    ref = ref.reshape(B, S, N)

    np.testing.assert_allclose(np.asarray(out), np.asarray(ref), rtol=1e-5, atol=1e-5)
    assert out_bias is None
    print("KERNEL_OK")
</pallas_src>

<mosaic_0001>
module attributes {stable_mosaic.version = 11 : i64} {
  func.func @_lora_row_parallel_kernel(%arg0: i32, %arg1: i32, %arg2: i32, %arg3: memref<16x128xf32, #tpu.memory_space<vmem>>, %arg4: memref<128x128xf32, #tpu.memory_space<vmem>>, %arg5: memref<16x8xf32, #tpu.memory_space<vmem>>, %arg6: memref<8x128xf32, #tpu.memory_space<vmem>>, %arg7: memref<1x128xf32, #tpu.memory_space<vmem>>, %arg8: memref<16x128xf32, #tpu.memory_space<vmem>>, %arg9: memref<16x128xf32, #tpu.memory_space<vmem>>) attributes {dimension_semantics = [#tpu.dimension_semantics<parallel>, #tpu.dimension_semantics<parallel>, #tpu.dimension_semantics<arbitrary>], iteration_bounds = array<i64: 1, 1, 1>, scalar_prefetch = 0 : i64, scratch_operands = 1 : i64, tpu.core_type = #tpu.core_type<tc>, window_params = [{transform_indices = @transform_0, window_bounds = array<i64: 16, 128>}, {transform_indices = @transform_1, window_bounds = array<i64: 128, 128>}, {transform_indices = @transform_2, window_bounds = array<i64: 16, 8>}, {transform_indices = @transform_3, window_bounds = array<i64: 8, 128>}, {transform_indices = @transform_4, window_bounds = array<i64: 1, 128>}, {transform_indices = @transform_5, window_bounds = array<i64: 16, 128>}]} {
    %c0_i32 = arith.constant 0 : i32
    %0 = arith.cmpi eq, %arg2, %c0_i32 : i32
    %1 = arith.extui %0 : i1 to i32
    %c0_i32_0 = arith.constant 0 : i32
    %2 = arith.cmpi ne, %1, %c0_i32_0 : i32
    scf.if %2 {
      %cst_10 = arith.constant 0.000000e+00 : f32
      %12 = vector.broadcast %cst_10 : f32 to vector<16x128xf32>
      %c0_11 = arith.constant 0 : index
      %c0_12 = arith.constant 0 : index
      %13 = vector.load %arg9[%c0_11, %c0_12] : memref<16x128xf32, #tpu.memory_space<vmem>>, vector<16x128xf32>
      tpu.vector_store %arg9[%c0_11, %c0_12], %12 {strides = array<i32>} : memref<16x128xf32, #tpu.memory_space<vmem>>, vector<16x128xf32>,
    } else {
    }
    %c0 = arith.constant 0 : index
    %c0_1 = arith.constant 0 : index
    %3 = vector.load %arg9[%c0, %c0_1] : memref<16x128xf32, #tpu.memory_space<vmem>>, vector<16x128xf32>
    %c0_2 = arith.constant 0 : index
    %c0_3 = arith.constant 0 : index
    %4 = vector.load %arg3[%c0_2, %c0_3] : memref<16x128xf32, #tpu.memory_space<vmem>>, vector<16x128xf32>
    %c0_4 = arith.constant 0 : index
    %c0_5 = arith.constant 0 : index
    %5 = vector.load %arg4[%c0_4, %c0_5] : memref<128x128xf32, #tpu.memory_space<vmem>>, vector<128x128xf32>
    %cst = arith.constant dense<0.000000e+00> : vector<16x128xf32>
    %6 = tpu.matmul %4, %5, %cst {dimension_numbers = #tpu.dot_dimension_numbers<[1], [0], [0], [1], [0, 0, 1, 1], [], []>} : vector<16x128xf32>, vector<128x128xf32>, vector<16x128xf32> -> vector<16x128xf32>
    %7 = arith.addf %3, %6 : vector<16x128xf32>
    %c0_6 = arith.constant 0 : index
    %c0_7 = arith.constant 0 : index
    %8 = vector.load %arg9[%c0_6, %c0_7] : memref<16x128xf32, #tpu.memory_space<vmem>>, vector<16x128xf32>
    tpu.vector_store %arg9[%c0_6, %c0_7], %7 {strides = array<i32>} : memref<16x128xf32, #tpu.memory_space<vmem>>, vector<16x128xf32>,
    %c0_i32_8 = arith.constant 0 : i32
    %9 = arith.cmpi eq, %arg2, %c0_i32_8 : i32
    %10 = arith.extui %9 : i1 to i32
    %c0_i32_9 = arith.constant 0 : i32
    %11 = arith.cmpi ne, %10, %c0_i32_9 : i32
    scf.if %11 {
      %c0_10 = arith.constant 0 : index
      %c0_11 = arith.constant 0 : index
      %12 = vector.load %arg5[%c0_10, %c0_11] : memref<16x8xf32, #tpu.memory_space<vmem>>, vector<16x8xf32>
      %c0_12 = arith.constant 0 : index
      %c0_13 = arith.constant 0 : index
      %13 = vector.load %arg6[%c0_12, %c0_13] : memref<8x128xf32, #tpu.memory_space<vmem>>, vector<8x128xf32>
      %cst_14 = arith.constant dense<0.000000e+00> : vector<16x128xf32>
      %14 = tpu.matmul %12, %13, %cst_14 {dimension_numbers = #tpu.dot_dimension_numbers<[1], [0], [0], [1], [0, 0, 1, 1], [], []>} : vector<16x8xf32>, vector<8x128xf32>, vector<16x128xf32> -> vector<16x128xf32>
      %c0_15 = arith.constant 0 : index
      %c0_16 = arith.constant 0 : index
      %15 = vector.load %arg9[%c0_15, %c0_16] : memref<16x128xf32, #tpu.memory_space<vmem>>, vector<16x128xf32>
      %16 = arith.addf %15, %14 : vector<16x128xf32>
      %c0_17 = arith.constant 0 : index
      %c0_18 = arith.constant 0 : index
      %17 = vector.load %arg7[%c0_17, %c0_18] : memref<1x128xf32, #tpu.memory_space<vmem>>, vector<1x128xf32>
      %18 = vector.broadcast %17 : vector<1x128xf32> to vector<16x128xf32>
      %19 = arith.addf %16, %18 : vector<16x128xf32>
      %c0_19 = arith.constant 0 : index
      %c0_20 = arith.constant 0 : index
      %20 = vector.load %arg8[%c0_19, %c0_20] : memref<16x128xf32, #tpu.memory_space<vmem>>, vector<16x128xf32>
      tpu.vector_store %arg8[%c0_19, %c0_20], %19 {strides = array<i32>} : memref<16x128xf32, #tpu.memory_space<vmem>>, vector<16x128xf32>,
    } else {
    }
    return
  }
  func.func @transform_0(%arg0: i32, %arg1: i32, %arg2: i32) -> (i32, i32) {
    %c0_i32 = arith.constant 0 : i32
    return %arg0, %arg2 : i32, i32
  }
  func.func @transform_1(%arg0: i32, %arg1: i32, %arg2: i32) -> (i32, i32) {
    %c0_i32 = arith.constant 0 : i32
    return %arg2, %arg1 : i32, i32
  }
  func.func @transform_2(%arg0: i32, %arg1: i32, %arg2: i32) -> (i32, i32) {
    %c0_i32 = arith.constant 0 : i32
    %c0_i32_0 = arith.constant 0 : i32
    return %arg0, %c0_i32 : i32, i32
  }
  func.func @transform_3(%arg0: i32, %arg1: i32, %arg2: i32) -> (i32, i32) {
    %c0_i32 = arith.constant 0 : i32
    %c0_i32_0 = arith.constant 0 : i32
    return %c0_i32, %arg1 : i32, i32
  }
  func.func @transform_4(%arg0: i32, %arg1: i32, %arg2: i32) -> (i32, i32) {
    %c0_i32 = arith.constant 0 : i32
    %c0_i32_0 = arith.constant 0 : i32
    return %c0_i32, %arg1 : i32, i32
  }
  func.func @transform_5(%arg0: i32, %arg1: i32, %arg2: i32) -> (i32, i32) {
    %c0_i32 = arith.constant 0 : i32
    return %arg0, %arg1 : i32, i32
  }
}

</mosaic_0001>

<bundles_post_ra>
// kernel: row_parallel_linear_with_lora.1
= control target key start
LH: loop header
LB: loop body
LE: loop exit
PB: predicated region body
PF: predicated region fallthrough
CT: control target
= control target key end

     0   :  { %vm131_vm0 = vcmask 64512   ;;  %s434_s1 = inlined_call_operand.vmem [shape: f32[128,128], index: 1, kind: input, shape index: {}]   ;;  %s435_s3 = inlined_call_operand.vmem [shape: f32[8,128], index: 3, kind: input, shape index: {}]   ;;  %s436_s2 = inlined_call_operand.vmem [shape: f32[16,8], index: 2, kind: input, shape index: {}]   ;;  %s437_s0 = inlined_call_operand.vmem [shape: f32[16,128], index: 0, kind: input, shape index: {}]   ;;  %s438_s4 = inlined_call_operand.vmem [shape: f32[1,128], index: 4, kind: input, shape index: {}]   ;;  %s439_s5 = inlined_call_operand.vmem [shape: f32[16,128], index: 5, kind: output, shape index: {}]  }
   0x1   :  { %v30_v0 = vld [vmem:[%s434_s1] sm:$0xff]  ;;  %v31_v1 = vld [vmem:[%s434_s1 + $0x8] sm:$0xff]  ;;  %v32_v2 = vld [vmem:[%s434_s1 + $0x10] sm:$0xff] }
   0x2   :  { %v296_v3 = vpack.c.bf16 %v31_v1, %v30_v0  ;;  %v33_v4 = vld [vmem:[%s434_s1 + $0x18] sm:$0xff]  ;;  %v34_v6 = vld [vmem:[%s434_s1 + $0x20] sm:$0xff]  ;;  %v35_v7 = vld [vmem:[%s434_s1 + $0x28] sm:$0xff] }
   0x3   :  { %v300_v5 = vpack.c.bf16 %v33_v4, %v32_v2  ;;  %v304_v8 = vpack.c.bf16 %v35_v7, %v34_v6  ;;  %v36_v9 = vld [vmem:[%s434_s1 + $0x30] sm:$0xff]  ;;  %v130_v10 = vld [vmem:[%s435_s3] sm:$0xff]  ;;  %v37_v12 = vld [vmem:[%s434_s1 + $0x38] sm:$0xff] }
   0x4   :  { %297 = vmatprep.subr.bf16.mxu1 %v296_v3  ;;  %v128_v11 = vld [vmem:[%s436_s2] sm:$0xff]  ;;  %291 = vmatprep.subr.mxu0 %v130_v10  ;;  %v129_v13 = vld [vmem:[%s436_s2 + $0x8] sm:$0xff]  ;;  %v308_v15 = vpack.c.bf16 %v37_v12, %v36_v9  ;;  %v40_v19 = vld [vmem:[%s434_s1 + $0x50] sm:$0xff] }
   0x5   :  { %299 = vmatpush3.bf16.msra.mxu1 %v296_v3  ;;  %293 = vmatprep.mubr.msk.f32.mxu0 %vm131_vm0, %v128_v11  ;;  %v28_v14 = vld [vmem:[%s437_s0] sm:$0xff]  ;;  %v39_v17 = vld [vmem:[%s434_s1 + $0x48] sm:$0xff]  ;;  %v41_v20 = vld [vmem:[%s434_s1 + $0x58] sm:$0xff] }
   0x6   :  { %301 = vmatprep.subr.bf16.mxu1 %v300_v5  ;;  %292 = vmatpush3.msra.mxu0 %v130_v10  ;;  %v38_v16 = vld [vmem:[%s434_s1 + $0x40] sm:$0xff]  ;;  %v316_v21 = vpack.c.bf16 %v41_v20, %v40_v19  ;;  %v43_v23 = vld [vmem:[%s434_s1 + $0x68] sm:$0xff]  ;;  %v44_v25 = vld [vmem:[%s434_s1 + $0x70] sm:$0xff] }
   0x7   :  { %288 = vmatprep.mubr.f32.mxu1 %v28_v14  ;;  %294 = vmatmul.mubr.msk.f32.vlgmr.msra.gmra.mrb[0].mxu0 %vm131_vm0, %v129_v13  ;;  %v312_v18 = vpack.c.bf16 %v39_v17, %v38_v16  ;;  %v42_v22 = vld [vmem:[%s434_s1 + $0x60] sm:$0xff]  ;;  %v45_v26 = vld [vmem:[%s434_s1 + $0x78] sm:$0xff]  ;;  %v29_v28 = vld [vmem:[%s437_s0 + $0x8] sm:$0xff] }
   0x8   :  { %v320_v24 = vpack.c.bf16 %v43_v23, %v42_v22  ;;  %v324_v27 = vpack.c.bf16 %v45_v26, %v44_v25  ;;  %v234_v32 = vld [vmem:[%s438_s4] ss:$0 sm:$0xff] }
   0x9   :  { %303 = vmatpush3.bf16.msra.mxu1 %v300_v5 }
   0xa   :  { %305 = vmatprep.subr.bf16.mxu1 %v304_v8 }
   0xd   :  { %307 = vmatpush3.bf16.msra.mxu1 %v304_v8 }
   0xe   :  { %309 = vmatprep.subr.bf16.mxu1 %v308_v15 }
  0x11   :  { %311 = vmatpush3.bf16.msra.mxu1 %v308_v15 }
  0x12   :  { %313 = vmatprep.subr.bf16.mxu1 %v312_v18 }
  0x15   :  { %315 = vmatpush3.bf16.msra.mxu1 %v312_v18 }
  0x16   :  { %317 = vmatprep.subr.bf16.mxu1 %v316_v21 }
  0x19   :  { %319 = vmatpush3.bf16.msra.mxu1 %v316_v21 }
  0x1a   :  { %321 = vmatprep.subr.bf16.mxu1 %v320_v24 }
  0x1d   :  { %323 = vmatpush3.bf16.msra.mxu1 %v320_v24 }
  0x1e   :  { %325 = vmatprep.subr.bf16.mxu1 %v324_v27 }
  0x21   :  { %327 = vmatpush3.bf16.msra.mxu1 %v324_v27 }
  0x24   :  { %289 = vmatmul.mubr.f32.vlgmr.msra.gmra.mrb[0].mxu1 %v29_v28 }
  0xda   :  { %v295_v29 = vpop.f32.mrb[0].mxu0 }
  0xdb   :  { %v204_v30 = vpop.f32.mrb[1].mxu0 }
  0xf7   :  { %v290_v31 = vpop.f32.mrb[0].mxu1 }
  0xf8   :  { %v216_v33 = vadd.f32 %v295_v29, %v290_v31  ;;  %v112_v34 = vpop.f32.mrb[1].mxu1 }
  0xf9   :  { %v215_v35 = vadd.f32 %v204_v30, %v112_v34 }
  0xfa   :  { %v225_v36 = vadd.f32 %v234_v32, %v216_v33 }
  0xfb   :  { %v224_v37 = vadd.f32 %v234_v32, %v215_v35 }
  0xfc   :  { %227 = vst [vmem:[%s439_s5 + $0x8] sm:$0xff] %v225_v36 }
  0xfd   :  { %226 = vst [vmem:[%s439_s5] sm:$0xff] %v224_v37 }

</bundles_post_ra>
